<compile_context>
chip_gen: v5e
topology: v5e:2x2
jax: 0.10.0
libtpu: 0.0.40
codegen_flags: <defaults>
</compile_context>

<pallas_src>
import functools
import math

import jax
import jax.numpy as jnp
from jax.experimental import pallas as pl
from jax.experimental.pallas import tpu as pltpu


def _label_smoothing_kernel(x_ref, t_ref, rowloss_ref, *, padding_idx,
                            confidence, smooth_val, const_c):
    x = x_ref[...]                                   # (tr, V) f32 log-probs
    t = t_ref[...]                                   # (tr, 1) i32 targets

    col = jax.lax.broadcasted_iota(jnp.int32, x.shape, 1)        # (tr, V)

    s_all = jnp.sum(x, axis=1, keepdims=True)                    # (tr, 1)
    x_tgt = jnp.sum(jnp.where(col == t, x, 0.0), axis=1,
                    keepdims=True)                               # (tr, 1)
    x_pad = x[:, padding_idx:padding_idx + 1]                    # (tr, 1)

    row_loss = (const_c
                - confidence * x_tgt
                - smooth_val * (s_all - x_tgt - x_pad))
    # Rows whose target is the padding index contribute exactly 0.
    rowloss_ref[...] = jnp.where(t == padding_idx, 0.0, row_loss)


def _choose_row_tile(n, v, target_block_bytes=4 << 20):
    """Rows per block: keep the x block ~4 MiB (double-buffered -> ~8 MiB),
    a multiple of 8, capped at 1024 and at the (8-rounded) problem size."""
    rows = max(8, target_block_bytes // (v * 4))
    rows = min(rows, 1024)
    n_pad8 = ((n + 7) // 8) * 8
    rows = min(rows, n_pad8)
    rows = max(8, (rows // 8) * 8)
    return int(rows)


def label_smoothing_loss(x, target, *, size, padding_idx, smoothing,
                         row_tile=None):
    """x: (N, size) float32 log-probs; target: (N,) int indices. Scalar f32."""
    N, V = x.shape
    assert V == size
    assert 0 <= padding_idx < size
    if smoothing > 0.0:
        assert size > 2, "smoothing/(size-2) requires size > 2"

    confidence = 1.0 - smoothing
    smooth_val = smoothing / (size - 2) if size > 2 else 0.0
    conf_term = confidence * math.log(confidence) if confidence > 0.0 else 0.0
    smooth_term = ((size - 2) * smooth_val * math.log(smooth_val)
                   if smooth_val > 0.0 else 0.0)
    const_c = conf_term + smooth_term

    if row_tile is None:
        row_tile = _choose_row_tile(N, V)

    n_blocks = -(-N // row_tile)                     # cdiv
    n_pad = n_blocks * row_tile

    t2d = target.astype(jnp.int32).reshape(N, 1)
    if n_pad != N:
        # Padded rows use target == padding_idx, so they contribute exactly 0.
        x = jnp.pad(x, ((0, n_pad - N), (0, 0)))
        t2d = jnp.pad(t2d, ((0, n_pad - N), (0, 0)),
                      constant_values=padding_idx)

    kernel = functools.partial(
        _label_smoothing_kernel, padding_idx=int(padding_idx),
        confidence=float(confidence), smooth_val=float(smooth_val),
        const_c=float(const_c))

    row_losses = pl.pallas_call(
        kernel,
        out_shape=jax.ShapeDtypeStruct((n_pad, 1), jnp.float32),
        grid_spec=pltpu.PrefetchScalarGridSpec(
            num_scalar_prefetch=0,
            grid=(n_blocks,),
            in_specs=[
                pl.BlockSpec((row_tile, V), lambda i: (i, 0)),
                pl.BlockSpec((row_tile, 1), lambda i: (i, 0)),
            ],
            out_specs=pl.BlockSpec((row_tile, 1), lambda i: (i, 0)),
        ),
        compiler_params=pltpu.CompilerParams(
            dimension_semantics=("parallel",),
            vmem_limit_bytes=32 << 20),
        cost_estimate=pl.CostEstimate(
            flops=5 * n_pad * V,
            transcendentals=0,
            bytes_accessed=n_pad * V * 4 + n_pad * 4 + n_pad * 4),
    )(x, t2d)

    return jnp.sum(row_losses)


def _reference(x, target, *, size, padding_idx, smoothing):
    confidence = 1.0 - smoothing
    smooth_val = smoothing / (size - 2)
    N, V = x.shape
    true_dist = jnp.full((N, V), smooth_val, jnp.float32)
    true_dist = true_dist.at[jnp.arange(N), target].set(confidence)
    true_dist = true_dist.at[:, padding_idx].set(0.0)
    true_dist = jnp.where((target == padding_idx)[:, None], 0.0, true_dist)
    kl = jnp.where(true_dist > 0.0,
                   true_dist * (jnp.log(jnp.maximum(true_dist, 1e-30)) - x),
                   0.0)
    return jnp.sum(kl)


if __name__ == "__main__":
    # Small shapes: N = batch*seq = 16 tokens, vocab size = 32.
    N, V = 16, 32
    PADDING_IDX = 0
    SMOOTHING = 0.1

    key = jax.random.PRNGKey(0)
    k_x, k_t = jax.random.split(key)
    logits = jax.random.normal(k_x, (N, V), dtype=jnp.float32)
    x = jax.nn.log_softmax(logits, axis=-1)                 # log-probabilities
    target = jax.random.randint(k_t, (N,), 0, V, dtype=jnp.int32)
    # A couple of padding rows to exercise the row-zeroing path.
    target = target.at[3].set(PADDING_IDX).at[7].set(PADDING_IDX)

    loss = label_smoothing_loss(x, target, size=V, padding_idx=PADDING_IDX,
                                smoothing=SMOOTHING)
    loss = jax.block_until_ready(loss)

    ref = _reference(x, target, size=V, padding_idx=PADDING_IDX,
                     smoothing=SMOOTHING)
    assert jnp.allclose(loss, ref, rtol=1e-5, atol=1e-5), (loss, ref)

    print("KERNEL_OK")
</pallas_src>

<mosaic_0001>
module attributes {stable_mosaic.version = 11 : i64} {
  func.func @_label_smoothing_kernel(%arg0: i32, %arg1: memref<16x32xf32, #tpu.memory_space<vmem>>, %arg2: memref<16x1xi32, #tpu.memory_space<vmem>>, %arg3: memref<16x1xf32, #tpu.memory_space<vmem>>) attributes {dimension_semantics = [#tpu.dimension_semantics<parallel>], iteration_bounds = array<i64: 1>, scalar_prefetch = 0 : i64, scratch_operands = 0 : i64, tpu.core_type = #tpu.core_type<tc>, window_params = [{transform_indices = @transform_0, window_bounds = array<i64: 16, 32>}, {transform_indices = @transform_1, window_bounds = array<i64: 16, 1>}, {transform_indices = @transform_2, window_bounds = array<i64: 16, 1>}]} {
    %c0 = arith.constant 0 : index
    %c0_0 = arith.constant 0 : index
    %0 = vector.load %arg1[%c0, %c0_0] : memref<16x32xf32, #tpu.memory_space<vmem>>, vector<16x32xf32>
    %c0_1 = arith.constant 0 : index
    %c0_2 = arith.constant 0 : index
    %1 = vector.load %arg2[%c0_1, %c0_2] : memref<16x1xi32, #tpu.memory_space<vmem>>, vector<16x1xi32>
    %2 = tpu.iota {dimensions = array<i32: 1>} : vector<16x32xi32>
    %cst = arith.constant dense<0.000000e+00> : vector<16xf32>
    %3 = vector.multi_reduction <add>, %0, %cst [1] : vector<16x32xf32> to vector<16xf32>
    %4 = vector.shape_cast %3 : vector<16xf32> to vector<16x1xf32>
    %5 = vector.broadcast %1 : vector<16x1xi32> to vector<16x32xi32>
    %6 = arith.cmpi eq, %2, %5 : vector<16x32xi32>
    %cst_3 = arith.constant 0.000000e+00 : f32
    %7 = vector.broadcast %cst_3 : f32 to vector<16x32xf32>
    %8 = arith.select %6, %0, %7 : vector<16x32xi1>, vector<16x32xf32>
    %cst_4 = arith.constant dense<0.000000e+00> : vector<16xf32>
    %9 = vector.multi_reduction <add>, %8, %cst_4 [1] : vector<16x32xf32> to vector<16xf32>
    %10 = vector.shape_cast %9 : vector<16xf32> to vector<16x1xf32>
    %11 = vector.extract_strided_slice %0 {offsets = [0, 0], sizes = [16, 1], strides = [1, 1]} : vector<16x32xf32> to vector<16x1xf32>
    %cst_5 = arith.constant 0.899999976 : f32
    %12 = vector.broadcast %cst_5 : f32 to vector<16x1xf32>
    %13 = arith.mulf %12, %10 : vector<16x1xf32>
    %cst_6 = arith.constant -0.665202737 : f32
    %14 = vector.broadcast %cst_6 : f32 to vector<16x1xf32>
    %15 = arith.subf %14, %13 : vector<16x1xf32>
    %16 = arith.subf %4, %10 : vector<16x1xf32>
    %17 = arith.subf %16, %11 : vector<16x1xf32>
    %cst_7 = arith.constant 0.00333333341 : f32
    %18 = vector.broadcast %cst_7 : f32 to vector<16x1xf32>
    %19 = arith.mulf %18, %17 : vector<16x1xf32>
    %20 = arith.subf %15, %19 : vector<16x1xf32>
    %c0_i32 = arith.constant 0 : i32
    %21 = vector.broadcast %c0_i32 : i32 to vector<16x1xi32>
    %22 = arith.cmpi eq, %1, %21 : vector<16x1xi32>
    %cst_8 = arith.constant 0.000000e+00 : f32
    %23 = vector.broadcast %cst_8 : f32 to vector<16x1xf32>
    %24 = arith.select %22, %23, %20 : vector<16x1xi1>, vector<16x1xf32>
    %c0_9 = arith.constant 0 : index
    %c0_10 = arith.constant 0 : index
    %25 = vector.load %arg3[%c0_9, %c0_10] : memref<16x1xf32, #tpu.memory_space<vmem>>, vector<16x1xf32>
    tpu.vector_store %arg3[%c0_9, %c0_10], %24 {strides = array<i32>} : memref<16x1xf32, #tpu.memory_space<vmem>>, vector<16x1xf32>,
    return
  }
  func.func @transform_0(%arg0: i32) -> (i32, i32) {
    %c0_i32 = arith.constant 0 : i32
    %c0_i32_0 = arith.constant 0 : i32
    return %arg0, %c0_i32 : i32, i32
  }
  func.func @transform_1(%arg0: i32) -> (i32, i32) {
    %c0_i32 = arith.constant 0 : i32
    %c0_i32_0 = arith.constant 0 : i32
    return %arg0, %c0_i32 : i32, i32
  }
  func.func @transform_2(%arg0: i32) -> (i32, i32) {
    %c0_i32 = arith.constant 0 : i32
    %c0_i32_0 = arith.constant 0 : i32
    return %arg0, %c0_i32 : i32, i32
  }
}

</mosaic_0001>

<bundles_post_ra>
// kernel: tpu_custom_call.1
= control target key start
LH: loop header
LB: loop body
LE: loop exit
PB: predicated region body
PF: predicated region fallthrough
CT: control target
= control target key end

     0   :  { %v65_v0 = vmov 0   ;;  %vm17_vm0 = vcmask 261120   ;;  %v15_v7 = vlaneseq  ;;  %vm56_vm4 = vcmask 7168   ;;  %s103_s1 = inlined_call_operand.vmem [shape: s32[16,1], index: 1, kind: input, shape index: {}]   ;;  %s104_s0 = inlined_call_operand.vmem [shape: f32[16,32], index: 0, kind: input, shape index: {}]   ;;  %s105_s2 = inlined_call_operand.vmem [shape: f32[16,1], index: 2, kind: output, shape index: {}]  }
   0x1   :  { %64 = vset.pattern.permute.xlu0 %v65_v0  ;;  %v13_v1 = vld [vmem:[%s103_s1] sm:$0xff]  ;;  %v14_v2 = vld [vmem:[%s103_s1 + $0x8] sm:$0xff] }
   0x2   :  { %25 = vperm.xlu0 %64, %v13_v1   ;;  %v11_v3 = vld [vmem:[%s104_s0] sm:$0xff]  ;;  %v12_v5 = vld [vmem:[%s104_s0 + $0x8] sm:$0xff]  ;;  %v16_v8 = vand.u32 127, %v15_v7  ;;  %vm52_vm3 = vcmp.eq.s32.totalorder %v13_v1, 0  ;;  %vm53_vm5 = vcmp.eq.s32.totalorder %v14_v2, 0 }
   0x3   :  { %v18_v4 = vsel %vm17_vm0, %v11_v3, 0.0  ;;  %v21_v6 = vsel %vm17_vm0, %v12_v5, 0.0 }
   0x4   :  { %19 = vadd.xlane.f32.xlu1 %v18_v4 }
   0xa   :  { %28 = vperm.xlu0 %64, %v14_v2  }
   0xc   :  { %22 = vadd.xlane.f32.xlu1 %v21_v6 }
  0x74   :  { %v26_v9 = vpop.permute.xlu0 %25 }
  0x75   :  { %vm30_vm1 = vcmp.eq.s32.totalorder %v16_v8, %v26_v9 }
  0x76   :  { %v32_v10 = vsel %vm30_vm1, %v11_v3, 0.0 }
  0x77   :  { %v34_v11 = vsel %vm17_vm0, %v32_v10, 0.0  ;;  %v20_v15 = vpop.xlane.xlu1 %19 }
  0x78   :  { %35 = vadd.xlane.f32.xlu2 %v34_v11 }
  0x7c   :  { %v29_v12 = vpop.permute.xlu0 %28 }
  0x7d   :  { %vm31_vm2 = vcmp.eq.s32.totalorder %v16_v8, %v29_v12 }
  0x7e   :  { %v33_v13 = vsel %vm31_vm2, %v12_v5, 0.0 }
  0x7f   :  { %v37_v14 = vsel %vm17_vm0, %v33_v13, 0.0  ;;  %v23_v22 = vpop.xlane.xlu1 %22 }
  0x80   :  { %38 = vadd.xlane.f32.xlu2 %v37_v14 }
  0xeb   :  { %v36_v16 = vpop.xlane.xlu2 %35 }
  0xec   :  { %v40_v17 = vmul.f32 0.9, %v36_v16  ;;  %v44_v18 = vsub.f32 %v20_v15, %v36_v16 }
  0xee   :  { %v46_v19 = vsub.f32 %v44_v18, %v11_v3  ;;  %v42_v20 = vsub.f32 -0.66520274, %v40_v17 }
  0xf0   :  { %v48_v21 = vmul.f32 0.0033333334, %v46_v19 }
  0xf2   :  { %v50_v23 = vsub.f32 %v42_v20, %v48_v21 }
  0xf3   :  { %v39_v24 = vpop.xlane.xlu2 %38 }
  0xf4   :  { %v54_v25 = vsel %vm52_vm3, 0.0, %v50_v23  ;;  %v41_v26 = vmul.f32 0.9, %v39_v24  ;;  %v45_v27 = vsub.f32 %v23_v22, %v39_v24 }
  0xf5   :  { %57 = vst.msk [vmem:[%s105_s2] sm:$0xff] %vm56_vm4, %v54_v25 }
  0xf6   :  { %v47_v28 = vsub.f32 %v45_v27, %v12_v5  ;;  %v43_v29 = vsub.f32 -0.66520274, %v41_v26 }
  0xf8   :  { %v49_v30 = vmul.f32 0.0033333334, %v47_v28 }
  0xfa   :  { %v51_v31 = vsub.f32 %v43_v29, %v49_v30 }
  0xfc   :  { %v55_v32 = vsel %vm53_vm5, 0.0, %v51_v31 }
  0xfd   :  { %58 = vst.msk [vmem:[%s105_s2 + $0x8] sm:$0xff] %vm56_vm4, %v55_v32 }

</bundles_post_ra>
